<compile_context>
chip_gen: v7x
topology: tpu7x:2x2x1
jax: 0.10.0
libtpu: 0.0.40
codegen_flags: <defaults>
</compile_context>

<pallas_src>
import functools
import math

import jax
import jax.numpy as jnp
from jax import lax
from jax.experimental import pallas as pl
from jax.experimental.pallas import tpu as pltpu


def _round_up(x: int, m: int) -> int:
    return (x + m - 1) // m * m


def _dot_t(x_tile, w_tile):
    # x_tile: (tm, tk), w_tile: (tn, tk). Contract the minor (K) axis of both
    # operands -> MXU-friendly transposed-RHS contraction, no XLU transpose of
    # the weight tile (same pattern as the q @ k^T score matmul).
    return lax.dot_general(
        x_tile, w_tile,
        dimension_numbers=(((1,), (1,)), ((), ())),
        preferred_element_type=jnp.float32,
    )


# ---------------------------------------------------------------------------
# Kernel bodies
# ---------------------------------------------------------------------------

def _linear_kernel_single_k(x_ref, w_ref, o_ref, *, scale):
    # Whole K in one block: no accumulator machinery, single dot per block.
    o_ref[...] = (_dot_t(x_ref[...], w_ref[...]) * scale).astype(o_ref.dtype)


def _linear_kernel_acc_inplace_f32(x_ref, w_ref, o_ref, *, scale):
    # f32 output: accumulate directly into the resident output block
    # (out index_map ignores k), no scratch and no finalize copy.
    k = pl.program_id(2)

    @pl.when(k == 0)
    def _():
        o_ref[...] = jnp.zeros_like(o_ref)

    o_ref[...] += _dot_t(x_ref[...], w_ref[...])

    @pl.when(k == pl.num_programs(2) - 1)
    def _():
        o_ref[...] = o_ref[...] * scale


def _linear_kernel_acc_scratch(x_ref, w_ref, o_ref, acc_ref, *, scale):
    # Non-f32 output: keep an f32 VMEM accumulator, cast once at finalize.
    k = pl.program_id(2)

    @pl.when(k == 0)
    def _():
        acc_ref[...] = jnp.zeros_like(acc_ref)

    acc_ref[...] += _dot_t(x_ref[...], w_ref[...])

    @pl.when(k == pl.num_programs(2) - 1)
    def _():
        o_ref[...] = (acc_ref[...] * scale).astype(o_ref.dtype)


# ---------------------------------------------------------------------------
# Wrapper
# ---------------------------------------------------------------------------

_FAST_PATH_BYTES = 4 * (1 << 20)   # raw x+w+out bytes that trigger the VMEM fast path
_VMEM_LIMIT_CAP = 48 * (1 << 20)   # stay well inside v7x's 64 MiB physical VMEM


def pallas_linear(x, weight_param, lr_mul: float = 1.0, *, tm: int = 512,
                  tn: int = 512, tk: int = 1024, weight_dtype=None,
                  _force_grid: bool = False):
    """Equivalent of Linear(in_f, out_f, lr_mul).forward(x).

    x:            (..., in_features)
    weight_param: (out_features, in_features)  -- the raw nn.Parameter
    weight_dtype: optional dtype to stream the weight in (e.g. jnp.bfloat16);
                  opt-in, slightly changes numerics. Accumulation stays f32.
    """
    out_f, in_f = weight_param.shape
    scale = (1.0 / math.sqrt(in_f)) * lr_mul

    if weight_dtype is not None:
        weight_param = weight_param.astype(weight_dtype)

    orig_shape = x.shape
    assert orig_shape[-1] == in_f, (orig_shape, in_f)
    m = 1
    for d in orig_shape[:-1]:
        m *= d
    x2d = x.reshape(m, in_f)

    out_dtype = x.dtype
    x_item = x.dtype.itemsize
    w_item = weight_param.dtype.itemsize
    o_item = jnp.dtype(out_dtype).itemsize

    # dtype-aware sublane alignment for M (f32->8, bf16->16, 8-bit->32).
    m_align = max(8, 32 // x_item)

    mp8 = _round_up(m, m_align)
    np128 = _round_up(out_f, 128)
    kp128 = _round_up(in_f, 128)

    raw_bytes = mp8 * kp128 * x_item + np128 * kp128 * w_item + mp8 * np128 * o_item
    fast = (not _force_grid) and raw_bytes <= _FAST_PATH_BYTES

    if fast:
        # Whole problem in VMEM: full-M, full-K blocks, collapse the K axis.
        tm_ = mp8
        tk_ = kp128
        blocks_n = np128 // 128
        # >=2 parallel j blocks when possible so v7x's 2nd TensorCore is used.
        nj = 2 if (blocks_n >= 2 and blocks_n % 2 == 0) else 1
        tn_ = np128 // nj
    else:
        tm_ = min(tm, mp8)
        tn_ = min(tn, np128)
        tk_ = min(tk, kp128)

    mp = _round_up(m, tm_)
    np_ = _round_up(out_f, tn_)
    kp = _round_up(in_f, tk_)

    # Zero-pad: K padding contributes 0 to the dot; M/N padding is sliced off.
    x_p = x2d if (mp == m and kp == in_f) else jnp.pad(
        x2d, ((0, mp - m), (0, kp - in_f)))
    w_p = weight_param if (np_ == out_f and kp == in_f) else jnp.pad(
        weight_param, ((0, np_ - out_f), (0, kp - in_f)))

    gi, gj, gk = mp // tm_, np_ // tn_, kp // tk_

    # VMEM working set: 2 buffers per input, 2 per output, plus acc scratch.
    use_scratch = (gk > 1) and (out_dtype != jnp.float32)
    vmem_needed = (2 * tm_ * tk_ * x_item + 2 * tn_ * tk_ * w_item
                   + 2 * tm_ * tn_ * o_item
                   + (tm_ * tn_ * 4 if use_scratch else 0))
    vmem_limit = int(min(max(vmem_needed + (8 << 20), 32 << 20), _VMEM_LIMIT_CAP))

    cost = pl.CostEstimate(
        flops=2 * mp * np_ * kp,
        transcendentals=0,
        bytes_accessed=int(mp * kp * x_item + np_ * kp * w_item + mp * np_ * o_item),
    )

    if gk == 1:
        kernel = functools.partial(_linear_kernel_single_k, scale=scale)
        grid = (gi, gj)
        in_specs = [
            pl.BlockSpec((tm_, tk_), lambda i, j: (i, 0)),
            pl.BlockSpec((tn_, tk_), lambda i, j: (j, 0)),
        ]
        out_specs = pl.BlockSpec((tm_, tn_), lambda i, j: (i, j))
        scratch_shapes = []
        dim_sem = ("parallel", "parallel")
    else:
        grid = (gi, gj, gk)
        in_specs = [
            pl.BlockSpec((tm_, tk_), lambda i, j, k: (i, k)),
            pl.BlockSpec((tn_, tk_), lambda i, j, k: (j, k)),
        ]
        out_specs = pl.BlockSpec((tm_, tn_), lambda i, j, k: (i, j))
        dim_sem = ("parallel", "parallel", "arbitrary")
        if use_scratch:
            kernel = functools.partial(_linear_kernel_acc_scratch, scale=scale)
            scratch_shapes = [pltpu.VMEM((tm_, tn_), jnp.float32)]
        else:
            kernel = functools.partial(_linear_kernel_acc_inplace_f32, scale=scale)
            scratch_shapes = []

    y_p = pl.pallas_call(
        kernel,
        out_shape=jax.ShapeDtypeStruct((mp, np_), out_dtype),
        grid_spec=pltpu.PrefetchScalarGridSpec(
            num_scalar_prefetch=0,
            grid=grid,
            in_specs=in_specs,
            out_specs=out_specs,
            scratch_shapes=scratch_shapes,
        ),
        compiler_params=pltpu.CompilerParams(
            dimension_semantics=dim_sem,
            vmem_limit_bytes=vmem_limit,
        ),
        cost_estimate=cost,
    )(x_p, w_p)

    return y_p[:m, :out_f].reshape(*orig_shape[:-1], out_f)


if __name__ == "__main__":
    key = jax.random.PRNGKey(0)
    k_x, k_w, k_x2, k_w2, k_x3, k_w3 = jax.random.split(key, 6)

    # --- Test 1: tiny mapping-net shape -> fast path, single grid step ------
    batch, in_features, out_features = 8, 32, 32
    lr_mul = 1.0
    weight_param = (1.0 / lr_mul) * jax.random.normal(
        k_w, (out_features, in_features), dtype=jnp.float32)
    x = jax.random.normal(k_x, (batch, in_features), dtype=jnp.float32)

    y = pallas_linear(x, weight_param, lr_mul=lr_mul)
    jax.block_until_ready(y)

    scale = (1.0 / math.sqrt(in_features)) * lr_mul
    y_ref = x @ (weight_param * scale).T
    assert y.shape == (batch, out_features)
    assert jnp.allclose(y, y_ref, atol=1e-5, rtol=1e-5)

    # --- Test 2: mapping-net-like with out=512 -> fast path, 2 parallel j
    #             blocks (second TensorCore on v7x), leading batch dims,
    #             non-unit lr_mul, N/K padding ------------------------------
    b2, s2, in2, out2 = 2, 4, 320, 512
    lr_mul2 = 0.01
    weight2 = (1.0 / lr_mul2) * jax.random.normal(
        k_w2, (out2, in2), dtype=jnp.float32)
    x2 = jax.random.normal(k_x2, (b2, s2, in2), dtype=jnp.float32)

    y2 = pallas_linear(x2, weight2, lr_mul=lr_mul2)
    jax.block_until_ready(y2)

    scale2 = (1.0 / math.sqrt(in2)) * lr_mul2
    y2_ref = x2 @ (weight2 * scale2).T
    assert y2.shape == (b2, s2, out2)
    assert jnp.allclose(y2, y2_ref, atol=2e-4, rtol=2e-4)

    # --- Test 3: forced multi-tile grid (K accumulation in-place in f32
    #             o_ref, N tiling, M/N/K padding) ---------------------------
    b3, s3, in3, out3 = 2, 4, 320, 200
    lr_mul3 = 0.01
    weight3 = (1.0 / lr_mul3) * jax.random.normal(
        k_w3, (out3, in3), dtype=jnp.float32)
    x3 = jax.random.normal(k_x3, (b3, s3, in3), dtype=jnp.float32)

    y3 = pallas_linear(x3, weight3, lr_mul=lr_mul3,
                       tm=8, tn=128, tk=128, _force_grid=True)
    jax.block_until_ready(y3)

    scale3 = (1.0 / math.sqrt(in3)) * lr_mul3
    y3_ref = x3 @ (weight3 * scale3).T
    assert y3.shape == (b3, s3, out3)
    assert jnp.allclose(y3, y3_ref, atol=2e-4, rtol=2e-4)

    # --- Test 4: bf16 inputs/weights, forced K grid -> f32 scratch
    #             accumulator path, dtype-aware M alignment ------------------
    b4, in4, out4 = 4, 256, 128
    x4 = jax.random.normal(k_x, (b4, in4), dtype=jnp.bfloat16)
    weight4 = jax.random.normal(k_w, (out4, in4), dtype=jnp.bfloat16)

    y4 = pallas_linear(x4, weight4, lr_mul=1.0,
                       tm=16, tn=128, tk=128, _force_grid=True)
    jax.block_until_ready(y4)

    scale4 = 1.0 / math.sqrt(in4)
    y4_ref = x4.astype(jnp.float32) @ (weight4.astype(jnp.float32) * scale4).T
    assert y4.shape == (b4, out4)
    assert jnp.allclose(y4.astype(jnp.float32), y4_ref, atol=6e-2, rtol=6e-2)

    print("KERNEL_OK")
</pallas_src>

<mosaic_0001>
module attributes {stable_mosaic.version = 11 : i64} {
  func.func @_linear_kernel_single_k(%arg0: i32, %arg1: i32, %arg2: memref<8x128xf32, #tpu.memory_space<vmem>>, %arg3: memref<128x128xf32, #tpu.memory_space<vmem>>, %arg4: memref<8x128xf32, #tpu.memory_space<vmem>>) attributes {dimension_semantics = [#tpu.dimension_semantics<parallel>, #tpu.dimension_semantics<parallel>], iteration_bounds = array<i64: 1, 1>, scalar_prefetch = 0 : i64, scratch_operands = 0 : i64, tpu.core_type = #tpu.core_type<tc>, window_params = [{transform_indices = @transform_0, window_bounds = array<i64: 8, 128>}, {transform_indices = @transform_1, window_bounds = array<i64: 128, 128>}, {transform_indices = @transform_2, window_bounds = array<i64: 8, 128>}]} {
    %c0 = arith.constant 0 : index
    %c0_0 = arith.constant 0 : index
    %0 = vector.load %arg2[%c0, %c0_0] : memref<8x128xf32, #tpu.memory_space<vmem>>, vector<8x128xf32>
    %c0_1 = arith.constant 0 : index
    %c0_2 = arith.constant 0 : index
    %1 = vector.load %arg3[%c0_1, %c0_2] : memref<128x128xf32, #tpu.memory_space<vmem>>, vector<128x128xf32>
    %cst = arith.constant dense<0.000000e+00> : vector<8x128xf32>
    %2 = tpu.matmul %0, %1, %cst {dimension_numbers = #tpu.dot_dimension_numbers<[1], [1], [0], [0], [0, 0, 1, 0], [], []>} : vector<8x128xf32>, vector<128x128xf32>, vector<8x128xf32> -> vector<8x128xf32>
    %cst_3 = arith.constant 0.176776692 : f32
    %3 = vector.broadcast %cst_3 : f32 to vector<8x128xf32>
    %4 = arith.mulf %2, %3 : vector<8x128xf32>
    %c0_4 = arith.constant 0 : index
    %c0_5 = arith.constant 0 : index
    %5 = vector.load %arg4[%c0_4, %c0_5] : memref<8x128xf32, #tpu.memory_space<vmem>>, vector<8x128xf32>
    tpu.vector_store %arg4[%c0_4, %c0_5], %4 {strides = array<i32>} : memref<8x128xf32, #tpu.memory_space<vmem>>, vector<8x128xf32>,
    return
  }
  func.func @transform_0(%arg0: i32, %arg1: i32) -> (i32, i32) {
    %c0_i32 = arith.constant 0 : i32
    %c0_i32_0 = arith.constant 0 : i32
    return %arg0, %c0_i32 : i32, i32
  }
  func.func @transform_1(%arg0: i32, %arg1: i32) -> (i32, i32) {
    %c0_i32 = arith.constant 0 : i32
    %c0_i32_0 = arith.constant 0 : i32
    return %arg1, %c0_i32 : i32, i32
  }
  func.func @transform_2(%arg0: i32, %arg1: i32) -> (i32, i32) {
    %c0_i32 = arith.constant 0 : i32
    return %arg0, %arg1 : i32, i32
  }
}

</mosaic_0001>

<bundles_post_ra>
// kernel: tpu_custom_call.1
= control target key start
LH: loop header
LB: loop body
LE: loop exit
PB: predicated region body
PF: predicated region fallthrough
CT: control target
= control target key end

     0   :  { %7 = vsyncpa [#allocation3], 0  ;;  %s365_s0 = inlined_call_operand.hbm [shape: f32[8,128], index: 0, kind: input, shape index: {}]   ;;  %s366_s1 = inlined_call_operand.hbm [shape: f32[128,128], index: 1, kind: input, shape index: {}]   ;;  %s367_s2 = inlined_call_operand.hbm [shape: f32[8,128], index: 2, kind: output, shape index: {}]  }
   0x1   :  { %8 = vsyncpa [#allocation6], 0 }
   0x2   :  { %9 = vsyncpa [#allocation4], 0  ;;  %s299_s9 = smov [#allocation2]   ;;  %s300_s11 = smov [#allocation5]  }
   0x3   :  { %s16_s10 = sshll.u32 %s299_s9, 4  ;;  %s25_s12 = sshll.u32 %s300_s11, 4  ;;  %s17_s10 = int_to_ptr.vmem [resolvable:$true] %s16_s10  ;;  %s322_s12 = int_to_ptr.vmem [resolvable:$true] %s25_s12 }
   0x4   :  { %s227_s15 = scalar_lea.hbm %s365_s0, 128 }
   0x5   :  { %p228_p0 = scmp.ne.s32.totalorder %s365_s0, %s227_s15  ;;  %p231_p1 = scmp.lt.u32.totalorder %s227_s15, %s365_s0 }
   0x7   :  { %p233_p2 = pnand %p231_p1, %p228_p0 }
   0x9   :  { %236 = shalt.err (!%p233_p2)
}
   0xa   :  { %s237_s20 = scalar_lea.vmem %s17_s10, 128  ;;  %p242_p4 = scmp.lt.s32.totalorder %s17_s10, %s17_s10 }
   0xb   :  { %p238_p3 = scmp.ne.s32.totalorder %s17_s10, %s237_s20  ;;  %p243_p5 = scmp.lt.s32.totalorder %s237_s20, %s237_s20 }
   0xd   :  { %p244_p6 = por %p243_p5, %p242_p4 }
   0xf   :  { %p245_p7 = pnand %p244_p6, %p238_p3 }
  0x11   :  { %248 = shalt.err (!%p245_p7)
}
  0x12   :  { %19 = dma.hbm_to_vmem [thread:$0]  %s365_s0, 128, %s17_s10, [#allocation3]  }
  0x13   :  { %s249_s25 = scalar_lea.hbm %s366_s1, 2048 }
  0x14   :  { %p250_p8 = scmp.ne.s32.totalorder %s366_s1, %s249_s25  ;;  %p253_p9 = scmp.lt.u32.totalorder %s249_s25, %s366_s1 }
  0x16   :  { %p255_p10 = pnand %p253_p9, %p250_p8 }
  0x18   :  { %258 = shalt.err (!%p255_p10)
}
  0x19   :  { %s259_s30 = scalar_lea.vmem %s322_s12, 2048  ;;  %p264_p12 = scmp.lt.s32.totalorder %s322_s12, %s322_s12 }
  0x1a   :  { %p260_p11 = scmp.ne.s32.totalorder %s322_s12, %s259_s30  ;;  %p265_p13 = scmp.lt.s32.totalorder %s259_s30, %s259_s30 }
  0x1c   :  { %p266_p0 = por %p265_p13, %p264_p12 }
  0x1e   :  { %p267_p1 = pnand %p266_p0, %p260_p11 }
  0x20   :  { %270 = shalt.err (!%p267_p1)
}
  0x21   :  { %s301_s0 = smov 128   ;;  %s302_s3 = smov 8  }
  0x22   :  { %31 = dma.hbm_to_vmem [thread:$0]  %s366_s1, 2048, %s322_s12, [#allocation6], %s301_s0, %s301_s0, %s302_s3  }
  0x23   :  { %293 = dma.done.wait [#allocation3], 128  }
  0x24   :  { %294 = vsyncadd [#allocation3], 4294967168 }
  0x25   :  { %295 = dma.done.wait [#allocation6], 2048  }
  0x26   :  { %296 = vsyncadd [#allocation6], 4294965248  ;;  %v303_v0 = vmov 0.0|0.0   ;;  %vm304_vm0 = vmmov 0   ;;  %v305_v1 = vmov 0.0   ;;  %v39_v2 = vld [vmem:[#allocation5] sm:$0xff] }
  0x27   :  { %195 = vmatprep.subr.bf16.mxu0 %v303_v0  ;;  %192 = vmatprep.mubr.msk.f32.mxu0 %vm304_vm0, %v305_v1  ;;  %v40_v3 = vld [vmem:[#allocation5 + $0x8] sm:$0xff]  ;;  %v41_v5 = vld [vmem:[#allocation5 + $0x10] sm:$0xff]  ;;  %v42_v6 = vld [vmem:[#allocation5 + $0x18] sm:$0xff]  ;;  %s306_s1 = smov [#allocation7]  }
  0x28   :  { %v196_v4 = vpack.c.bf16 %v40_v3, %v39_v2  ;;  %v199_v7 = vpack.c.bf16 %v42_v6, %v41_v5  ;;  %v43_v8 = vld [vmem:[#allocation5 + $0x20] sm:$0xff]  ;;  %v44_v9 = vld [vmem:[#allocation5 + $0x28] sm:$0xff]  ;;  %v45_v11 = vld [vmem:[#allocation5 + $0x30] sm:$0xff]  ;;  %s133_s6 = sshll.u32 %s306_s1, 4  ;;  %s134_s6 = int_to_ptr.vmem [resolvable:$true] %s133_s6 }
  0x29   :  { %v202_v10 = vpack.c.bf16 %v44_v9, %v43_v8  ;;  %v46_v12 = vld [vmem:[#allocation5 + $0x38] sm:$0xff]  ;;  %v47_v14 = vld [vmem:[#allocation5 + $0x40] sm:$0xff]  ;;  %v48_v15 = vld [vmem:[#allocation5 + $0x48] sm:$0xff]  ;;  %s271_s7 = scalar_lea.vmem %s134_s6, 128  ;;  %p276_p3 = scmp.lt.s32.totalorder %s134_s6, %s134_s6 }
  0x2a   :  { %197 = vmatpush3.bf16.xpose.msra.mxu0 %v196_v4  ;;  %v205_v13 = vpack.c.bf16 %v46_v12, %v45_v11  ;;  %v208_v16 = vpack.c.bf16 %v48_v15, %v47_v14  ;;  %v49_v17 = vld [vmem:[#allocation5 + $0x50] sm:$0xff]  ;;  %v50_v18 = vld [vmem:[#allocation5 + $0x58] sm:$0xff]  ;;  %v51_v20 = vld [vmem:[#allocation5 + $0x60] sm:$0xff]  ;;  %p272_p2 = scmp.ne.s32.totalorder %s134_s6, %s271_s7  ;;  %p277_p4 = scmp.lt.s32.totalorder %s271_s7, %s271_s7 }
  0x2b   :  { %198 = vmatprep.subr.bf16.mxu0 %v303_v0  ;;  %v211_v19 = vpack.c.bf16 %v50_v18, %v49_v17  ;;  %v52_v21 = vld [vmem:[#allocation5 + $0x68] sm:$0xff]  ;;  %v53_v23 = vld [vmem:[#allocation5 + $0x70] sm:$0xff]  ;;  %v54_v24 = vld [vmem:[#allocation5 + $0x78] sm:$0xff] }
  0x2c   :  { %v214_v22 = vpack.c.bf16 %v52_v21, %v51_v20  ;;  %v217_v25 = vpack.c.bf16 %v54_v24, %v53_v23  ;;  %v38_v26 = vld [vmem:[#allocation2] sm:$0xff]  ;;  %p278_p5 = por %p277_p4, %p276_p3 }
  0x2e   :  { %p279_p6 = pnand %p278_p5, %p272_p2 }
  0x32   :  { %200 = vmatpush3.bf16.xpose.msra.mxu0 %v199_v7 }
  0x33   :  { %201 = vmatprep.subr.bf16.mxu0 %v303_v0 }
  0x3a   :  { %203 = vmatpush3.bf16.xpose.msra.mxu0 %v202_v10 }
  0x3b   :  { %204 = vmatprep.subr.bf16.mxu0 %v303_v0 }
  0x42   :  { %206 = vmatpush3.bf16.xpose.msra.mxu0 %v205_v13 }
  0x43   :  { %207 = vmatprep.subr.bf16.mxu0 %v303_v0 }
  0x4a   :  { %209 = vmatpush3.bf16.xpose.msra.mxu0 %v208_v16 }
  0x4b   :  { %210 = vmatprep.subr.bf16.mxu0 %v303_v0 }
  0x52   :  { %212 = vmatpush3.bf16.xpose.msra.mxu0 %v211_v19 }
  0x53   :  { %213 = vmatprep.subr.bf16.mxu0 %v303_v0 }
  0x5a   :  { %215 = vmatpush3.bf16.xpose.msra.mxu0 %v214_v22 }
  0x5b   :  { %216 = vmatprep.subr.bf16.mxu0 %v303_v0 }
  0x62   :  { %218 = vmatpush3.bf16.xpose.msra.mxu0 %v217_v25 }
  0x69   :  { %193 = vmatmul.mubr.f32.vlgmr.msra.gmra.mrb[0].mxu0 %v38_v26 }
 0x13c   :  { %v121_v27 = vpop.f32.mrb[0].mxu0 }
 0x13d   :  { %v125_v28 = vmul.f32 0.17677669, %v121_v27  ;;  %v194_v29 = vpop.f32.mrb[1].mxu0 }
 0x13f   :  { %126 = vst [vmem:[#allocation7] sm:$0xff] %v125_v28 }
 0x140   :  { %282 = shalt.err (!%p279_p6)
}
 0x141   :  { %s283_s10 = scalar_lea.hbm %s367_s2, 128 }
 0x142   :  { %p284_p7 = scmp.ne.s32.totalorder %s367_s2, %s283_s10  ;;  %p287_p8 = scmp.lt.u32.totalorder %s283_s10, %s367_s2 }
 0x144   :  { %p289_p9 = pnand %p287_p8, %p284_p7 }
 0x146   :  { %292 = shalt.err (!%p289_p9)
}
 0x147   :  { %136 = dma.vmem_to_hbm [thread:$0]  %s134_s6, 128, %s367_s2, [#allocation4]  }
 0x148   :  { %297 = dma.done.wait [#allocation4], 128  }
 0x149   :  { %298 = vsyncadd [#allocation4], 4294967168 }
 0x14a   :  { %140 = vsyncpa [#allocation3], 1 }
 0x14b   :  { %141 = vsyncpa [#allocation6], 1 }
 0x14c   :  { %142 = vsyncpa [#allocation4], 1 }

</bundles_post_ra>
